<compile_context>
chip_gen: v7x
topology: tpu7x:2x2x1
jax: 0.10.0
libtpu: 0.0.40
codegen_flags: <defaults>
</compile_context>

<pallas_src>
import functools

import jax
import jax.numpy as jnp
from jax import lax
from jax.experimental import pallas as pl
from jax.experimental.pallas import tpu as pltpu


def _frn_kernel(x_ref, params_ref, eps_ref, o_ref, *, inv_hw):
    p = params_ref[...]                     # (tile_rows, 3) = [gamma | beta | tau]
    g = p[:, 0:1]
    b = p[:, 1:2]
    t = p[:, 2:3]

    x = x_ref[...].astype(jnp.float32)      # (tile_rows, HW); cast happens in vregs
    nu2 = jnp.sum(x * x, axis=-1, keepdims=True) * inv_hw
    xn = x * lax.rsqrt(nu2 + eps_ref[0])
    o_ref[...] = jnp.maximum(g * xn + b, t).astype(o_ref.dtype)


# Total VMEM footprint budget for the pipelined buffers:
#   2 (double-buffer) x (x-in block + out block) + 2 x params block.
# 40 MiB keeps ample headroom on v7x (64 MiB VMEM/TC, the tightest part)
# while giving ~10 MiB x blocks, already in the 85%+-of-HBM-roofline regime
# measured on v6e/v5e (128 MiB VMEM).
_VMEM_FOOTPRINT_BUDGET = 40 << 20


def _choose_tile_rows(r, hw, itemsize, footprint_budget=_VMEM_FOOTPRINT_BUDGET):
    """Row tile (multiple of 8) sized so the double-buffered blocks fit the budget."""
    # Per-row cost: 2x(in+out) x-blocks in the *input dtype* plus the params
    # block, whose 3 lanes pad to 128 in VMEM (512 B/row, double-buffered).
    per_row = 4 * hw * itemsize + 2 * 128 * 4
    rows = footprint_budget // per_row
    rows = max(8, (rows // 8) * 8)
    r8 = ((r + 7) // 8) * 8
    rows = min(rows, r8)
    # If the whole problem fits in one tile, split it in two so a 2-TC part
    # (v7x) can run one tile per core; costs only one ~0.35us extra grid step
    # on single-TC v5e/v6e.
    if rows >= r8 and r > 8:
        rows = max(8, ((((r + 1) // 2) + 7) // 8) * 8)
    return rows


def frn_norm(x, gamma, beta, tau, eps):
    """FRN forward.

    x:     (N, C, H, W)
    gamma, beta, tau: (1, C, 1, 1)
    eps:   scalar, shape (1,)
    """
    N, C, H, W = x.shape
    R = N * C
    HW = H * W
    itemsize = jnp.dtype(x.dtype).itemsize

    tile_rows = _choose_tile_rows(R, HW, itemsize)
    grid = (pl.cdiv(R, tile_rows),)

    x2d = x.reshape(R, HW)                  # free view: no extra HBM pass

    # Pack per-row affine params into one small table: a single tiny per-tile
    # DMA instead of three lane-width-1 DMAs per step.
    def per_row(p):
        return jnp.broadcast_to(p.reshape(1, C), (N, C)).reshape(R)

    params = jnp.stack(
        [per_row(gamma), per_row(beta), per_row(tau)], axis=-1
    ).astype(jnp.float32)                   # (R, 3)

    eps_abs = jnp.abs(eps).reshape(1).astype(jnp.float32)  # hoisted out of kernel

    # Actual pipelined-buffer footprint -> explicit scoped-VMEM request.
    block_bytes = tile_rows * HW * itemsize
    params_block_bytes = tile_rows * 128 * 4
    footprint = 4 * block_bytes + 2 * params_block_bytes
    vmem_limit = int(max(32 << 20, footprint + (4 << 20)))
    # TODO(synk): for extreme H*W (a single 8-row block already over the
    # budget) switch to a lane-chunked two-pass variant (accumulate sum(x^2)
    # in VMEM scratch over a second grid axis, finalize with pl.when) instead
    # of just raising the scoped limit.

    kernel = functools.partial(_frn_kernel, inv_hw=1.0 / HW)

    out2d = pl.pallas_call(
        kernel,
        out_shape=jax.ShapeDtypeStruct((R, HW), x.dtype),
        grid_spec=pltpu.PrefetchScalarGridSpec(
            num_scalar_prefetch=0,
            grid=grid,
            in_specs=[
                pl.BlockSpec((tile_rows, HW), lambda i: (i, 0)),    # x tile
                pl.BlockSpec((tile_rows, 3), lambda i: (i, 0)),     # params tile
                pl.BlockSpec(memory_space=pltpu.MemorySpace.SMEM),  # |eps| scalar
            ],
            out_specs=pl.BlockSpec((tile_rows, HW), lambda i: (i, 0)),
        ),
        compiler_params=pltpu.CompilerParams(
            dimension_semantics=("parallel",),
            vmem_limit_bytes=vmem_limit,
        ),
    )(x2d, params, eps_abs)

    return out2d.reshape(N, C, H, W)


def frn_norm_ref(x, gamma, beta, tau, eps):
    """Plain-JAX reference mirroring the PyTorch forward."""
    nu2 = jnp.mean(jnp.square(x), axis=(2, 3), keepdims=True)
    xn = x * lax.rsqrt(nu2 + jnp.abs(eps))
    return jnp.maximum(gamma * xn + beta, tau)


if __name__ == "__main__":
    key = jax.random.PRNGKey(0)
    N, C, H, W = 2, 4, 16, 16

    x = jax.random.normal(key, (N, C, H, W), dtype=jnp.float32)

    # Parameters per FRNNorm.reset_parameters(): gamma=1, beta=0, tau=0, eps=1e-6.
    gamma = jnp.ones((1, C, 1, 1), dtype=jnp.float32)
    beta = jnp.zeros((1, C, 1, 1), dtype=jnp.float32)
    tau = jnp.zeros((1, C, 1, 1), dtype=jnp.float32)
    eps = jnp.array([1e-6], dtype=jnp.float32)

    out = frn_norm(x, gamma, beta, tau, eps)
    out = jax.block_until_ready(out)

    ref = frn_norm_ref(x, gamma, beta, tau, eps)
    assert out.shape == (N, C, H, W)
    assert jnp.allclose(out, ref, atol=1e-5, rtol=1e-5), "mismatch vs reference"

    # Also exercise a ragged shape on the same code path: N*C not a multiple
    # of the row tile (partial last block) and H*W not a multiple of 128
    # (masked tail stores instead of wrapper padding).
    key2 = jax.random.PRNGKey(1)
    x2 = jax.random.normal(key2, (3, 5, 14, 14), dtype=jnp.float32)
    g2 = jnp.ones((1, 5, 1, 1), jnp.float32)
    b2 = jnp.zeros((1, 5, 1, 1), jnp.float32)
    t2 = jnp.zeros((1, 5, 1, 1), jnp.float32)
    out2 = jax.block_until_ready(frn_norm(x2, g2, b2, t2, eps))
    ref2 = frn_norm_ref(x2, g2, b2, t2, eps)
    assert jnp.allclose(out2, ref2, atol=1e-5, rtol=1e-5), "ragged-shape mismatch"

    print("KERNEL_OK")
</pallas_src>

<mosaic_0001>
module attributes {stable_mosaic.version = 11 : i64} {
  func.func @_frn_kernel(%arg0: i32, %arg1: memref<8x256xf32, #tpu.memory_space<vmem>>, %arg2: memref<8x3xf32, #tpu.memory_space<vmem>>, %arg3: memref<1xf32, #tpu.memory_space<smem>>, %arg4: memref<8x256xf32, #tpu.memory_space<vmem>>) attributes {dimension_semantics = [#tpu.dimension_semantics<parallel>], iteration_bounds = array<i64: 1>, scalar_prefetch = 0 : i64, scratch_operands = 0 : i64, tpu.core_type = #tpu.core_type<tc>, window_params = [{transform_indices = @transform_0, window_bounds = array<i64: 8, 256>}, {transform_indices = @transform_1, window_bounds = array<i64: 8, 3>}, {transform_indices = @transform_2, window_bounds = array<i64: 1>}, {transform_indices = @transform_3, window_bounds = array<i64: 8, 256>}]} {
    %c0 = arith.constant 0 : index
    %c0_0 = arith.constant 0 : index
    %0 = vector.load %arg2[%c0, %c0_0] : memref<8x3xf32, #tpu.memory_space<vmem>>, vector<8x3xf32>
    %1 = vector.extract_strided_slice %0 {offsets = [0, 0], sizes = [8, 1], strides = [1, 1]} : vector<8x3xf32> to vector<8x1xf32>
    %2 = vector.extract_strided_slice %0 {offsets = [0, 1], sizes = [8, 1], strides = [1, 1]} : vector<8x3xf32> to vector<8x1xf32>
    %3 = vector.extract_strided_slice %0 {offsets = [0, 2], sizes = [8, 1], strides = [1, 1]} : vector<8x3xf32> to vector<8x1xf32>
    %c0_1 = arith.constant 0 : index
    %c0_2 = arith.constant 0 : index
    %4 = vector.load %arg1[%c0_1, %c0_2] : memref<8x256xf32, #tpu.memory_space<vmem>>, vector<8x256xf32>
    %5 = arith.mulf %4, %4 : vector<8x256xf32>
    %cst = arith.constant dense<0.000000e+00> : vector<8xf32>
    %6 = vector.multi_reduction <add>, %5, %cst [1] : vector<8x256xf32> to vector<8xf32>
    %7 = vector.shape_cast %6 : vector<8xf32> to vector<8x1xf32>
    %cst_3 = arith.constant 3.906250e-03 : f32
    %8 = vector.broadcast %cst_3 : f32 to vector<8x1xf32>
    %9 = arith.mulf %7, %8 : vector<8x1xf32>
    %c0_4 = arith.constant 0 : index
    %10 = memref.load %arg3[%c0_4] : memref<1xf32, #tpu.memory_space<smem>>
    %11 = vector.broadcast %10 : f32 to vector<8x1xf32>
    %12 = arith.addf %9, %11 : vector<8x1xf32>
    %13 = math.rsqrt %12 : vector<8x1xf32>
    %14 = vector.broadcast %13 : vector<8x1xf32> to vector<8x256xf32>
    %15 = arith.mulf %4, %14 : vector<8x256xf32>
    %16 = vector.broadcast %1 : vector<8x1xf32> to vector<8x256xf32>
    %17 = arith.mulf %16, %15 : vector<8x256xf32>
    %18 = vector.broadcast %2 : vector<8x1xf32> to vector<8x256xf32>
    %19 = arith.addf %17, %18 : vector<8x256xf32>
    %20 = vector.broadcast %3 : vector<8x1xf32> to vector<8x256xf32>
    %21 = arith.maximumf %19, %20 : vector<8x256xf32>
    %c0_5 = arith.constant 0 : index
    %c0_6 = arith.constant 0 : index
    %22 = vector.load %arg4[%c0_5, %c0_6] : memref<8x256xf32, #tpu.memory_space<vmem>>, vector<8x256xf32>
    tpu.vector_store %arg4[%c0_5, %c0_6], %21 {strides = array<i32>} : memref<8x256xf32, #tpu.memory_space<vmem>>, vector<8x256xf32>,
    return
  }
  func.func @transform_0(%arg0: i32) -> (i32, i32) {
    %c0_i32 = arith.constant 0 : i32
    %c0_i32_0 = arith.constant 0 : i32
    return %arg0, %c0_i32 : i32, i32
  }
  func.func @transform_1(%arg0: i32) -> (i32, i32) {
    %c0_i32 = arith.constant 0 : i32
    %c0_i32_0 = arith.constant 0 : i32
    return %arg0, %c0_i32 : i32, i32
  }
  func.func @transform_2(%arg0: i32) -> i32 {
    %c0_i32 = arith.constant 0 : i32
    %c0_i32_0 = arith.constant 0 : i32
    return %c0_i32 : i32
  }
  func.func @transform_3(%arg0: i32) -> (i32, i32) {
    %c0_i32 = arith.constant 0 : i32
    %c0_i32_0 = arith.constant 0 : i32
    return %arg0, %c0_i32 : i32, i32
  }
}

</mosaic_0001>

<bundles_post_ra>
// kernel: tpu_custom_call.1
= control target key start
LH: loop header
LB: loop body
LE: loop exit
PB: predicated region body
PF: predicated region fallthrough
CT: control target
= control target key end

     0   :  { %9 = vsyncpa [#allocation4], 0  ;;  %s193_s0 = inlined_call_operand.hbm [shape: f32[8,256], index: 0, kind: input, shape index: {}]   ;;  %s194_s1 = inlined_call_operand.vmem [shape: f32[8,3], index: 1, kind: input, shape index: {}]   ;;  %s195_s2 = inlined_call_operand.<no memory space> [shape: f32[1], index: 2, kind: input, shape index: {}]   ;;  %s196_s3 = inlined_call_operand.hbm [shape: f32[8,256], index: 3, kind: output, shape index: {}]  }
   0x1   :  { %10 = vsyncpa [#allocation5], 0  ;;  %s138_s12 = smov [#allocation3]   ;;  %s90_s16 = scalar_lea.hbm %s193_s0, 256 }
   0x2   :  { %s17_s13 = sshll.u32 %s138_s12, 4  ;;  %p91_p0 = scmp.ne.s32.totalorder %s193_s0, %s90_s16  ;;  %s18_s13 = int_to_ptr.vmem [resolvable:$true] %s17_s13 }
   0x3   :  { %p94_p1 = scmp.lt.u32.totalorder %s90_s16, %s193_s0 }
   0x5   :  { %p96_p2 = pnand %p94_p1, %p91_p0 }
   0x7   :  { %99 = shalt.err (!%p96_p2)
}
   0x8   :  { %s100_s21 = scalar_lea.vmem %s18_s13, 256  ;;  %p105_p4 = scmp.lt.s32.totalorder %s18_s13, %s18_s13 }
   0x9   :  { %p101_p3 = scmp.ne.s32.totalorder %s18_s13, %s100_s21  ;;  %p106_p5 = scmp.lt.s32.totalorder %s100_s21, %s100_s21 }
   0xb   :  { %p107_p6 = por %p106_p5, %p105_p4 }
   0xd   :  { %p108_p7 = pnand %p107_p6, %p101_p3 }
   0xf   :  { %111 = shalt.err (!%p108_p7)
}
  0x10   :  { %20 = dma.hbm_to_vmem [thread:$0]  %s193_s0, 256, %s18_s13, [#allocation4]  }
  0x11   :  { %134 = dma.done.wait [#allocation4], 256  }
  0x12   :  { %135 = vsyncadd [#allocation4], 4294967040  ;;  %v139_v0 = vmov 1   ;;  %v140_v1 = vmov 0   ;;  %v29_v2 = vld [vmem:[#allocation3] sm:$0xff]  ;;  %v30_v3 = vld [vmem:[#allocation3 + $0x8] sm:$0xff]  ;;  %v38_v9 = vstv %s195_s2 }
  0x13   :  { %85 = vset.pattern.permute.xlu1 %v139_v0  ;;  %84 = vset.pattern.permute.xlu0 %v140_v1  ;;  %v28_v4 = vld [vmem:[%s194_s1] sm:$0xff]  ;;  %v31_v5 = vmul.f32 %v29_v2, %v29_v2  ;;  %v32_v6 = vmul.f32 %v30_v3, %v30_v3  ;;  %v141_v8 = vmov 2   ;;  %s142_s1 = smov [#allocation6]  }
  0x14   :  { %51 = vperm.xlu1 %85, %v28_v4   ;;  %s70_s27 = sshll.u32 %s142_s1, 4  ;;  %s71_s27 = int_to_ptr.vmem [resolvable:$true] %s70_s27 }
  0x15   :  { %v33_v7 = vadd.f32 %v32_v6, %v31_v5  ;;  %s112_s2 = scalar_lea.vmem %s71_s27, 256  ;;  %p117_p9 = scmp.lt.s32.totalorder %s71_s27, %s71_s27 }
  0x16   :  { %p113_p8 = scmp.ne.s32.totalorder %s71_s27, %s112_s2  ;;  %p118_p10 = scmp.lt.s32.totalorder %s112_s2, %s112_s2 }
  0x17   :  { %34 = vadd.xlane.f32.xlu0 %v33_v7 }
  0x18   :  { %86 = vset.pattern.permute.xlu1 %v141_v8  ;;  %p119_p11 = por %p118_p10, %p117_p9 }
  0x19   :  { %57 = vperm.xlu1 %86, %v28_v4  }
  0x1a   :  { %p120_p12 = pnand %p119_p11, %p113_p8 }
  0x2d   :  { %45 = vperm.xlu0 %84, %v28_v4  }
  0x31   :  { %87 = vset.pattern.permute.xlu0 %v141_v8 }
  0x93   :  { %v52_v13 = vpop.permute.xlu1 %51 }
  0x98   :  { %v58_v20 = vpop.permute.xlu1 %57 }
  0xa4   :  { %v35_v10 = vpop.xlane.xlu0 %34 }
  0xa5   :  { %v36_v11 = vmul.f32 0.00390625, %v35_v10 }
  0xa7   :  { %v39_v12 = vadd.f32 %v38_v9, %v36_v11 }
  0xa9   :  { %88 = vrsqrt.f32 %v39_v12 }
  0xac   :  { %v46_v15 = vpop.permute.xlu0 %45 }
  0xb3   :  { %v89_v14 = vpop.eup %88 }
  0xb4   :  { %v41_v16 = vmul.f32 %v89_v14, %v29_v2  ;;  %v42_v17 = vmul.f32 %v89_v14, %v30_v3 }
  0xb6   :  { %v48_v18 = vmul.f32 %v46_v15, %v41_v16  ;;  %v49_v19 = vmul.f32 %v46_v15, %v42_v17 }
  0xb8   :  { %v54_v21 = vadd.f32 %v52_v13, %v48_v18  ;;  %v55_v22 = vadd.f32 %v52_v13, %v49_v19 }
  0xba   :  { %v60_v23 = vmax.f32 %v54_v21, %v58_v20  ;;  %v61_v24 = vmax.f32 %v55_v22, %v58_v20 }
  0xbc   :  { %62 = vst [vmem:[#allocation6] sm:$0xff] %v60_v23  ;;  %63 = vst [vmem:[#allocation6 + $0x8] sm:$0xff] %v61_v24 }
  0xbd   :  { %123 = shalt.err (!%p120_p12)
}
  0xbe   :  { %s124_s30 = scalar_lea.hbm %s196_s3, 256 }
  0xbf   :  { %p125_p13 = scmp.ne.s32.totalorder %s196_s3, %s124_s30  ;;  %p128_p0 = scmp.lt.u32.totalorder %s124_s30, %s196_s3 }
  0xc1   :  { %p130_p1 = pnand %p128_p0, %p125_p13 }
  0xc3   :  { %133 = shalt.err (!%p130_p1)
}
  0xc4   :  { %73 = dma.vmem_to_hbm [thread:$0]  %s71_s27, 256, %s196_s3, [#allocation5]  }
  0xc5   :  { %136 = dma.done.wait [#allocation5], 256  }
  0xc6   :  { %137 = vsyncadd [#allocation5], 4294967040 }
  0xc7   :  { %77 = vsyncpa [#allocation4], 1 }
  0xc8   :  { %78 = vsyncpa [#allocation5], 1 }

</bundles_post_ra>
